<compile_context>
chip_gen: v5e
topology: v5e:2x2
jax: 0.10.0
libtpu: 0.0.40
codegen_flags: <defaults>
</compile_context>

<pallas_src>
import jax
import jax.numpy as jnp
from jax.experimental import pallas as pl
from jax.experimental.pallas import tpu as pltpu

INPUT_SIZE = 784
HIDDEN = 50
NUM_CLASSES = 10

# Hidden padded 50 -> 64 (sublane-aligned MXU K dim). Zero padding is inert:
# relu(0 + 0) = 0 and zero W2 rows contribute nothing.
HIDDEN_PAD = 64


def _round_up(n, m):
    return (n + m - 1) // m * m


def _mlp_kernel(x_ref, w1_ref, b1_ref, w2_ref, b2_ref, o_ref):
    # One batch tile: h = relu(x @ W1 + b1) ; o = h @ W2 + b2
    # x arrives f32 (single HBM pass) and is cast to bf16 in-register for the
    # MXU; biases and accumulation stay f32.
    x = x_ref[...].astype(jnp.bfloat16)                               # (tb, 784)
    h = jnp.dot(x, w1_ref[...], preferred_element_type=jnp.float32)   # (tb, 64)
    h = jnp.maximum(h + b1_ref[...], 0.0)
    o = jnp.dot(h.astype(jnp.bfloat16), w2_ref[...],
                preferred_element_type=jnp.float32)                   # (tb, 10)
    o_ref[...] = (o + b2_ref[...]).astype(o_ref.dtype)


def prepare_params(w1, b1, w2, b2):
    """One-time layout plumbing (call at init, NOT per forward):
    pad hidden 50 -> 64 with zeros, cast weights to bf16, biases to f32.

    w1: (784, 50)  (transposed vs. PyTorch's (out, in))
    b1: (50,) or (1, 50)
    w2: (50, 10)
    b2: (10,) or (1, 10)
    """
    w1p = jnp.zeros((INPUT_SIZE, HIDDEN_PAD), jnp.bfloat16)
    w1p = w1p.at[:, :HIDDEN].set(w1.astype(jnp.bfloat16))
    b1p = jnp.zeros((1, HIDDEN_PAD), jnp.float32)
    b1p = b1p.at[:, :HIDDEN].set(jnp.reshape(b1, (1, HIDDEN)).astype(jnp.float32))
    w2p = jnp.zeros((HIDDEN_PAD, NUM_CLASSES), jnp.bfloat16)
    w2p = w2p.at[:HIDDEN, :].set(w2.astype(jnp.bfloat16))
    b2p = jnp.reshape(b2, (1, NUM_CLASSES)).astype(jnp.float32)
    return w1p, b1p, w2p, b2p


def nn_forward(x, w1p, b1p, w2p, b2p, *, block_b=2048):
    """Fused fc1 -> ReLU -> fc2 forward pass.

    x: (B, 784) float32 (or bf16); params from prepare_params().
    returns (B, 10) float32
    """
    B = x.shape[0]

    # Batch tile: multiple of 8 sublanes; small batches collapse to one block.
    tb = min(_round_up(block_b, 8), _round_up(B, 8))
    grid = (pl.cdiv(B, tb),)   # partial final block handles the batch tail

    flops = 2 * B * (INPUT_SIZE * HIDDEN_PAD + HIDDEN_PAD * NUM_CLASSES)
    bytes_accessed = (x.size * x.dtype.itemsize
                      + w1p.size * 2 + w2p.size * 2
                      + b1p.size * 4 + b2p.size * 4
                      + B * NUM_CLASSES * 4)

    return pl.pallas_call(
        _mlp_kernel,
        out_shape=jax.ShapeDtypeStruct((B, NUM_CLASSES), jnp.float32),
        grid_spec=pltpu.PrefetchScalarGridSpec(
            num_scalar_prefetch=0,
            grid=grid,
            in_specs=[
                pl.BlockSpec((tb, INPUT_SIZE), lambda i: (i, 0)),          # x tile
                pl.BlockSpec((INPUT_SIZE, HIDDEN_PAD), lambda i: (0, 0)),  # W1 resident
                pl.BlockSpec((1, HIDDEN_PAD), lambda i: (0, 0)),           # b1 resident
                pl.BlockSpec((HIDDEN_PAD, NUM_CLASSES), lambda i: (0, 0)), # W2 resident
                pl.BlockSpec((1, NUM_CLASSES), lambda i: (0, 0)),          # b2 resident
            ],
            out_specs=pl.BlockSpec((tb, NUM_CLASSES), lambda i: (i, 0)),
        ),
        compiler_params=pltpu.CompilerParams(
            dimension_semantics=("parallel",),       # v7x: shard batch over 2 TCs
            vmem_limit_bytes=32 * 1024 * 1024,       # v5e default is 16 MiB; tb=2048
        ),                                           # f32 x needs ~13 MiB dbl-buffered
        cost_estimate=pl.CostEstimate(
            flops=flops, transcendentals=0, bytes_accessed=bytes_accessed),
    )(x, w1p, b1p, w2p, b2p)


def init_params(key):
    """PyTorch Linear default init: U(-1/sqrt(fan_in), 1/sqrt(fan_in)).
    Weights stored as (in, out) — transposed relative to PyTorch's (out, in)."""
    k1, k2, k3, k4 = jax.random.split(key, 4)
    bound1 = 1.0 / (INPUT_SIZE ** 0.5)
    bound2 = 1.0 / (HIDDEN ** 0.5)
    w1 = jax.random.uniform(k1, (INPUT_SIZE, HIDDEN), jnp.float32, -bound1, bound1)
    b1 = jax.random.uniform(k2, (1, HIDDEN), jnp.float32, -bound1, bound1)
    w2 = jax.random.uniform(k3, (HIDDEN, NUM_CLASSES), jnp.float32, -bound2, bound2)
    b2 = jax.random.uniform(k4, (1, NUM_CLASSES), jnp.float32, -bound2, bound2)
    return w1, b1, w2, b2


def _ref_forward(x, w1, b1, w2, b2):
    # Plain-JAX reference matching the kernel's bf16 inputs / bf16 hidden.
    xb = x.astype(jnp.bfloat16).astype(jnp.float32)
    w1b = w1.astype(jnp.bfloat16).astype(jnp.float32)
    w2b = w2.astype(jnp.bfloat16).astype(jnp.float32)
    h = jnp.maximum(xb @ w1b + b1.reshape(1, -1), 0.0)
    h = h.astype(jnp.bfloat16).astype(jnp.float32)
    return h @ w2b + b2.reshape(1, -1)


if __name__ == "__main__":
    key = jax.random.PRNGKey(0)
    kx, kp = jax.random.split(key)
    w1, b1, w2, b2 = init_params(kp)
    params = prepare_params(w1, b1, w2, b2)   # layout plumbing done once

    # Small batch (single partial block path).
    batch = 2
    x = jax.random.normal(kx, (batch, INPUT_SIZE), jnp.float32)
    out = jax.block_until_ready(nn_forward(x, *params))
    ref = _ref_forward(x, w1, b1, w2, b2)
    assert out.shape == (batch, NUM_CLASSES)
    assert jnp.allclose(out, ref, atol=1e-2, rtol=1e-2)

    # Larger, non-tile-multiple batch exercises the multi-step grid + tail block.
    batch2 = 600
    x2 = jax.random.normal(kx, (batch2, INPUT_SIZE), jnp.float32)
    out2 = jax.block_until_ready(nn_forward(x2, *params, block_b=256))
    ref2 = _ref_forward(x2, w1, b1, w2, b2)
    assert out2.shape == (batch2, NUM_CLASSES)
    assert jnp.allclose(out2, ref2, atol=1e-2, rtol=1e-2)

    print("KERNEL_OK")
</pallas_src>

<mosaic_0001>
module attributes {stable_mosaic.version = 11 : i64} {
  func.func @_mlp_kernel(%arg0: i32, %arg1: memref<8x784xf32, #tpu.memory_space<vmem>>, %arg2: memref<784x64xbf16, #tpu.memory_space<vmem>>, %arg3: memref<1x64xf32, #tpu.memory_space<vmem>>, %arg4: memref<64x10xbf16, #tpu.memory_space<vmem>>, %arg5: memref<1x10xf32, #tpu.memory_space<vmem>>, %arg6: memref<8x10xf32, #tpu.memory_space<vmem>>) attributes {dimension_semantics = [#tpu.dimension_semantics<parallel>], iteration_bounds = array<i64: 1>, scalar_prefetch = 0 : i64, scratch_operands = 0 : i64, tpu.core_type = #tpu.core_type<tc>, window_params = [{transform_indices = @transform_0, window_bounds = array<i64: 8, 784>}, {pipeline_mode = #tpu.pipeline_mode<synchronous>, transform_indices = @transform_1, window_bounds = array<i64: 784, 64>}, {pipeline_mode = #tpu.pipeline_mode<synchronous>, transform_indices = @transform_2, window_bounds = array<i64: 1, 64>}, {pipeline_mode = #tpu.pipeline_mode<synchronous>, transform_indices = @transform_3, window_bounds = array<i64: 64, 10>}, {pipeline_mode = #tpu.pipeline_mode<synchronous>, transform_indices = @transform_4, window_bounds = array<i64: 1, 10>}, {transform_indices = @transform_5, window_bounds = array<i64: 8, 10>}]} {
    %c0 = arith.constant 0 : index
    %c0_0 = arith.constant 0 : index
    %0 = vector.load %arg1[%c0, %c0_0] : memref<8x784xf32, #tpu.memory_space<vmem>>, vector<8x784xf32>
    %1 = arith.truncf %0 : vector<8x784xf32> to vector<8x784xbf16>
    %c0_1 = arith.constant 0 : index
    %c0_2 = arith.constant 0 : index
    %2 = vector.load %arg2[%c0_1, %c0_2] : memref<784x64xbf16, #tpu.memory_space<vmem>>, vector<784x64xbf16>
    %cst = arith.constant dense<0.000000e+00> : vector<8x64xf32>
    %3 = tpu.matmul %1, %2, %cst {dimension_numbers = #tpu.dot_dimension_numbers<[1], [0], [0], [1], [0, 0, 1, 1], [], []>} : vector<8x784xbf16>, vector<784x64xbf16>, vector<8x64xf32> -> vector<8x64xf32>
    %c0_3 = arith.constant 0 : index
    %c0_4 = arith.constant 0 : index
    %4 = vector.load %arg3[%c0_3, %c0_4] : memref<1x64xf32, #tpu.memory_space<vmem>>, vector<1x64xf32>
    %5 = vector.broadcast %4 : vector<1x64xf32> to vector<8x64xf32>
    %6 = arith.addf %3, %5 : vector<8x64xf32>
    %cst_5 = arith.constant 0.000000e+00 : f32
    %7 = vector.broadcast %cst_5 : f32 to vector<8x64xf32>
    %8 = arith.maximumf %6, %7 : vector<8x64xf32>
    %9 = arith.truncf %8 : vector<8x64xf32> to vector<8x64xbf16>
    %c0_6 = arith.constant 0 : index
    %c0_7 = arith.constant 0 : index
    %10 = vector.load %arg4[%c0_6, %c0_7] : memref<64x10xbf16, #tpu.memory_space<vmem>>, vector<64x10xbf16>
    %cst_8 = arith.constant dense<0.000000e+00> : vector<8x10xf32>
    %11 = tpu.matmul %9, %10, %cst_8 {dimension_numbers = #tpu.dot_dimension_numbers<[1], [0], [0], [1], [0, 0, 1, 1], [], []>} : vector<8x64xbf16>, vector<64x10xbf16>, vector<8x10xf32> -> vector<8x10xf32>
    %c0_9 = arith.constant 0 : index
    %c0_10 = arith.constant 0 : index
    %12 = vector.load %arg5[%c0_9, %c0_10] : memref<1x10xf32, #tpu.memory_space<vmem>>, vector<1x10xf32>
    %13 = vector.broadcast %12 : vector<1x10xf32> to vector<8x10xf32>
    %14 = arith.addf %11, %13 : vector<8x10xf32>
    %c0_11 = arith.constant 0 : index
    %c0_12 = arith.constant 0 : index
    %15 = vector.load %arg6[%c0_11, %c0_12] : memref<8x10xf32, #tpu.memory_space<vmem>>, vector<8x10xf32>
    tpu.vector_store %arg6[%c0_11, %c0_12], %14 {strides = array<i32>} : memref<8x10xf32, #tpu.memory_space<vmem>>, vector<8x10xf32>,
    return
  }
  func.func @transform_0(%arg0: i32) -> (i32, i32) {
    %c0_i32 = arith.constant 0 : i32
    %c0_i32_0 = arith.constant 0 : i32
    return %arg0, %c0_i32 : i32, i32
  }
  func.func @transform_1(%arg0: i32) -> (i32, i32) {
    %c0_i32 = arith.constant 0 : i32
    %c0_i32_0 = arith.constant 0 : i32
    %c0_i32_1 = arith.constant 0 : i32
    return %c0_i32, %c0_i32_0 : i32, i32
  }
  func.func @transform_2(%arg0: i32) -> (i32, i32) {
    %c0_i32 = arith.constant 0 : i32
    %c0_i32_0 = arith.constant 0 : i32
    %c0_i32_1 = arith.constant 0 : i32
    return %c0_i32, %c0_i32_0 : i32, i32
  }
  func.func @transform_3(%arg0: i32) -> (i32, i32) {
    %c0_i32 = arith.constant 0 : i32
    %c0_i32_0 = arith.constant 0 : i32
    %c0_i32_1 = arith.constant 0 : i32
    return %c0_i32, %c0_i32_0 : i32, i32
  }
  func.func @transform_4(%arg0: i32) -> (i32, i32) {
    %c0_i32 = arith.constant 0 : i32
    %c0_i32_0 = arith.constant 0 : i32
    %c0_i32_1 = arith.constant 0 : i32
    return %c0_i32, %c0_i32_0 : i32, i32
  }
  func.func @transform_5(%arg0: i32) -> (i32, i32) {
    %c0_i32 = arith.constant 0 : i32
    %c0_i32_0 = arith.constant 0 : i32
    return %arg0, %c0_i32 : i32, i32
  }
}

</mosaic_0001>

<bundles_post_ra>
// kernel: tpu_custom_call.1
= control target key start
LH: loop header
LB: loop body
LE: loop exit
PB: predicated region body
PF: predicated region fallthrough
CT: control target
= control target key end

     0   :  { %10 = vsyncpa [#allocation3], 0  ;;  %vm470_vm0 = vcmask 130048   ;;  %vm603_vm1 = vcmask 523264   ;;  %vm620_vm2 = vcmask 80896   ;;  %s1163_s0 = inlined_call_operand.vmem [shape: f32[2,784], index: 0, kind: input, shape index: {}]   ;;  %s1164_s1 = inlined_call_operand.vmem [shape: bf16[784,64], index: 1, kind: input, shape index: {}]   ;;  %s1165_s2 = inlined_call_operand.vmem [shape: f32[1,64], index: 2, kind: input, shape index: {}]   ;;  %s1166_s3 = inlined_call_operand.vmem [shape: bf16[64,10], index: 3, kind: input, shape index: {}]   ;;  %s1167_s4 = inlined_call_operand.vmem [shape: f32[1,10], index: 4, kind: input, shape index: {}]   ;;  %s1168_s5 = inlined_call_operand.hbm [shape: f32[2,10], index: 5, kind: output, shape index: {}]  }
   0x1   :  { %v861_v0 = vld [vmem:[%s1164_s1 + $0x38] sm:$0xff]  ;;  %v860_v3 = vld [vmem:[%s1164_s1 + $0x30] sm:$0xff]  ;;  %v859_v7 = vld [vmem:[%s1164_s1 + $0x28] sm:$0xff] }
   0x2   :  { %v869_v1 = vld [vmem:[%s1164_s1 + $0x78] sm:$0xff]  ;;  %474 = vmatpush.bf16.msra.mxu0 %v861_v0  ;;  %v868_v4 = vld [vmem:[%s1164_s1 + $0x70] sm:$0xff]  ;;  %v867_v8 = vld [vmem:[%s1164_s1 + $0x68] sm:$0xff] }
   0x3   :  { %v877_v2 = vld [vmem:[%s1164_s1 + $0xb8] sm:$0xff]  ;;  %487 = vmatpush.bf16.msra.mxu1 %v869_v1  ;;  %v876_v5 = vld [vmem:[%s1164_s1 + $0xb0] sm:$0xff]  ;;  %v875_v9 = vld [vmem:[%s1164_s1 + $0xa8] sm:$0xff] }
   0x4   :  { %500 = vmatpush.bf16.msra.mxu2 %v877_v2  ;;  %v885_v6 = vld [vmem:[%s1164_s1 + $0xf8] sm:$0xff]  ;;  %v884_v10 = vld [vmem:[%s1164_s1 + $0xf0] sm:$0xff]  ;;  %v858_v11 = vld [vmem:[%s1164_s1 + $0x20] sm:$0xff] }
   0x5   :  { %513 = vmatpush.bf16.msra.mxu3 %v885_v6  ;;  %v866_v12 = vld [vmem:[%s1164_s1 + $0x60] sm:$0xff]  ;;  %v883_v14 = vld [vmem:[%s1164_s1 + $0xe8] sm:$0xff]  ;;  %v857_v19 = vld [vmem:[%s1164_s1 + $0x18] sm:$0xff] }
   0x6   :  { %475 = vmatpush.bf16.msra.mxu0 %v860_v3  ;;  %v874_v13 = vld [vmem:[%s1164_s1 + $0xa0] sm:$0xff]  ;;  %v24_v16 = vld [vmem:[%s1163_s0 + $0xe] sm:$0xff]  ;;  %v865_v20 = vld [vmem:[%s1164_s1 + $0x58] sm:$0xff] }
   0x7   :  { %488 = vmatpush.bf16.msra.mxu1 %v868_v4  ;;  %v22_v15 = vld [vmem:[%s1163_s0] sm:$0xff]  ;;  %v28_v18 = vld [vmem:[%s1163_s0 + $0x2a] sm:$0xff]  ;;  %40 = vst [vmem:[#allocation1 + $0x1] ss:$4 sm:$0xff] %v24_v16  ;;  %v873_v21 = vld [vmem:[%s1164_s1 + $0x98] sm:$0xff] }
   0x8   :  { %501 = vmatpush.bf16.msra.mxu2 %v876_v5  ;;  %v26_v17 = vld [vmem:[%s1163_s0 + $0x1c] sm:$0xff]  ;;  %38 = vst [vmem:[#allocation1] ss:$4 sm:$0xff] %v22_v15  ;;  %v856_v23 = vld [vmem:[%s1164_s1 + $0x10] sm:$0xff]  ;;  %v23_v24 = vld [vmem:[%s1163_s0 + $0x8] sm:$0x3f] }
   0x9   :  { %514 = vmatpush.bf16.msra.mxu3 %v884_v10  ;;  %42 = vst [vmem:[#allocation1 + $0x2] ss:$4 sm:$0xff] %v26_v17  ;;  %v882_v22 = vld [vmem:[%s1164_s1 + $0xe0] sm:$0xff]  ;;  %v25_v25 = vld [vmem:[%s1163_s0 + $0x16] sm:$0x3f]  ;;  %v855_v31 = vld [vmem:[%s1164_s1 + $0x8] sm:$0xff] }
   0xa   :  { %476 = vmatpush.bf16.msra.mxu0 %v859_v7  ;;  %44 = vst [vmem:[#allocation1 + $0x3] ss:$4 sm:$0xff] %v28_v18  ;;  %v864_v26 = vld [vmem:[%s1164_s1 + $0x50] sm:$0xff]  ;;  %v27_v27 = vld [vmem:[%s1163_s0 + $0x24] sm:$0x3f]  ;;  %v881_v30 = vld [vmem:[%s1164_s1 + $0xd8] sm:$0xff] }
   0xb   :  { %489 = vmatpush.bf16.msra.mxu1 %v867_v8  ;;  %v29_v28 = vld [vmem:[%s1163_s0 + $0x32] sm:$0x3f]  ;;  %46 = vst [vmem:[#allocation1 + $0x20] ss:$4 sm:$0xff] %v23_v24  ;;  %v863_v32 = vld [vmem:[%s1164_s1 + $0x48] sm:$0xff]  ;;  %v854_v35 = vld [vmem:[%s1164_s1] sm:$0xff] }
   0xc   :  { %502 = vmatpush.bf16.msra.mxu2 %v875_v9  ;;  %v872_v29 = vld [vmem:[%s1164_s1 + $0x90] sm:$0xff]  ;;  %48 = vst [vmem:[#allocation1 + $0x21] ss:$4 sm:$0xff] %v25_v25  ;;  %v871_v33 = vld [vmem:[%s1164_s1 + $0x88] sm:$0xff]  ;;  %v862_v36 = vld [vmem:[%s1164_s1 + $0x40] sm:$0xff] }
   0xd   :  { %515 = vmatpush.bf16.msra.mxu3 %v883_v14  ;;  %50 = vst [vmem:[#allocation1 + $0x22] ss:$4 sm:$0xff] %v27_v27  ;;  %v880_v34 = vld [vmem:[%s1164_s1 + $0xd0] sm:$0xff]  ;;  %v893_v39 = vld [vmem:[%s1164_s1 + $0x138] sm:$0xff]  ;;  %v870_v41 = vld [vmem:[%s1164_s1 + $0x80] sm:$0xff] }
   0xe   :  { %477 = vmatpush.bf16.msra.mxu0 %v858_v11  ;;  %52 = vst [vmem:[#allocation1 + $0x23] ss:$4 sm:$0xff] %v29_v28  ;;  %v901_v40 = vld [vmem:[%s1164_s1 + $0x178] sm:$0xff]  ;;  %v879_v42 = vld [vmem:[%s1164_s1 + $0xc8] sm:$0xff]  ;;  %v902_v46 = vld [vmem:[%s1164_s1 + $0x180] sm:$0xff] }
   0xf   :  { %490 = vmatpush.bf16.msra.mxu1 %v866_v12  ;;  %v892_v47 = vld [vmem:[%s1164_s1 + $0x130] sm:$0xff]  ;;  %v878_v50 = vld [vmem:[%s1164_s1 + $0xc0] sm:$0xff]  ;;  %v891_v52 = vld [vmem:[%s1164_s1 + $0x128] sm:$0xff] }
  0x10   :  { %503 = vmatpush.bf16.msra.mxu2 %v874_v13  ;;  %v900_v48 = vld [vmem:[%s1164_s1 + $0x170] sm:$0xff]  ;;  %v899_v53 = vld [vmem:[%s1164_s1 + $0x168] sm:$0xff]  ;;  %v890_v55 = vld [vmem:[%s1164_s1 + $0x120] sm:$0xff] }
  0x11   :  { %516 = vmatpush.bf16.msra.mxu3 %v882_v22  ;;  %v53_v37 = vld.sshfl [vmem:[#allocation1] sm:$0xff pattern:$0x73625140]  ;;  %v54_v38 = vld.sshfl [vmem:[#allocation1 + $0x8] sm:$0xff pattern:$0x73625140] }
  0x12   :  { %478 = vmatpush.bf16.msra.mxu0 %v857_v19  ;;  %v55_v43 = vld.sshfl [vmem:[#allocation1 + $0x10] sm:$0xff pattern:$0x73625140]  ;;  %v67_v44 = vpack.c.bf16 %v53_v37, %v53_v37  ;;  %v68_v45 = vpack.c.bf16 %v54_v38, %v54_v38  ;;  %v56_v51 = vld.sshfl [vmem:[#allocation1 + $0x18] sm:$0xff pattern:$0x73625140] }
  0x13   :  { %491 = vmatpush.bf16.msra.mxu1 %v865_v20  ;;  %v69_v49 = vpack.c.bf16 %v55_v43, %v55_v43  ;;  %v70_v54 = vpack.c.bf16 %v56_v51, %v56_v51  ;;  %v898_v56 = vld [vmem:[%s1164_s1 + $0x160] sm:$0xff]  ;;  %v889_v57 = vld [vmem:[%s1164_s1 + $0x118] sm:$0xff]  ;;  %v888_v60 = vld [vmem:[%s1164_s1 + $0x110] sm:$0xff] }
  0x14   :  { %504 = vmatpush.bf16.msra.mxu2 %v873_v21  ;;  %v897_v58 = vld [vmem:[%s1164_s1 + $0x158] sm:$0xff]  ;;  %v896_v61 = vld [vmem:[%s1164_s1 + $0x150] sm:$0xff]  ;;  %v887_v63 = vld [vmem:[%s1164_s1 + $0x108] sm:$0xff] }
  0x15   :  { %517 = vmatpush.bf16.msra.mxu3 %v881_v30  ;;  %v59_v59 = vld.sshfl [vmem:[#allocation1 + $0x30] sm:$0xff pattern:$0x73625140]  ;;  %v895_v0 = vld [vmem:[%s1164_s1 + $0x148] sm:$0xff]  ;;  %v886_v1 = vld [vmem:[%s1164_s1 + $0x100] sm:$0xff] }
  0x16   :  { %479 = vmatpush.bf16.msra.mxu0 %v856_v23  ;;  %v73_v62 = vpack.c.bf16 %v59_v59, %v59_v59  ;;  %v894_v2 = vld [vmem:[%s1164_s1 + $0x140] sm:$0xff]  ;;  %v58_v4 = vld.sshfl [vmem:[#allocation1 + $0x28] sm:$0xff pattern:$0x73625140]  ;;  %v906_v7 = vld [vmem:[%s1166_s3 + $0x18] sm:$0xff] }
  0x17   :  { %492 = vmatpush.bf16.msra.mxu1 %v864_v26  ;;  %v57_v3 = vld.sshfl [vmem:[#allocation1 + $0x20] sm:$0xff pattern:$0x73625140]  ;;  %v72_v6 = vpack.c.bf16 %v58_v4, %v58_v4  ;;  %v905_v8 = vld [vmem:[%s1166_s3 + $0x10] sm:$0xff]  ;;  %v904_v9 = vld [vmem:[%s1166_s3 + $0x8] sm:$0xff] }
  0x18   :  { %505 = vmatpush.bf16.msra.mxu2 %v872_v29  ;;  %v71_v5 = vpack.c.bf16 %v57_v3, %v57_v3  ;;  %v903_v12 = vld [vmem:[%s1166_s3] sm:$0xff] }
  0x19   :  { %518 = vmatpush.bf16.msra.mxu3 %v880_v34  ;;  %v910_v16 = vld [vmem:[%s1165_s2] ss:$0 sm:$0xff] }
  0x1a   :  { %480 = vmatpush.bf16.msra.mxu0 %v855_v31 }
  0x1b   :  { %493 = vmatpush.bf16.msra.mxu1 %v863_v32 }
  0x1c   :  { %506 = vmatpush.bf16.msra.mxu2 %v871_v33 }
  0x1d   :  { %519 = vmatpush.bf16.msra.mxu3 %v879_v42 }
  0x1e   :  { %481 = vmatpush.bf16.msra.mxu0 %v854_v35  ;;  %v911_v35 = vld [vmem:[%s1167_s4] ss:$0 sm:$0xff] }
  0x1f   :  { %494 = vmatpush.bf16.msra.mxu1 %v862_v36 }
  0x20   :  { %507 = vmatpush.bf16.msra.mxu2 %v870_v41 }
  0x21   :  { %482 = vmatmul.bf16.vlgmr.msra.gmra.mxu0 %v67_v44  ;;  %520 = vmatpush.bf16.msra.mxu3 %v878_v50 }
  0x22   :  { %526 = vmatpush.bf16.msrb.mxu0 %v893_v39  ;;  %495 = vmatmul.bf16.vlgmr.msra.gmra.mxu1 %v68_v45 }
  0x23   :  { %539 = vmatpush.bf16.msrb.mxu1 %v901_v40  ;;  %508 = vmatmul.bf16.vlgmr.msra.gmra.mxu2 %v69_v49 }
  0x24   :  { %559 = vmatpush.bf16.msrb.mxu2 %v902_v46  ;;  %521 = vmatmul.bf16.vlgmr.msra.gmra.mxu3 %v70_v54 }
  0x25   :  { %611 = vmatpush.bf16.msrb.mxu3 %v906_v7 }
  0x26   :  { %527 = vmatpush.bf16.msrb.mxu0 %v892_v47 }
  0x27   :  { %540 = vmatpush.bf16.msrb.mxu1 %v900_v48 }
  0x29   :  { %612 = vmatpush.bf16.msrb.mxu3 %v905_v8 }
  0x2a   :  { %528 = vmatpush.bf16.msrb.mxu0 %v891_v52 }
  0x2b   :  { %541 = vmatpush.bf16.msrb.mxu1 %v899_v53 }
  0x2d   :  { %613 = vmatpush.bf16.msrb.mxu3 %v904_v9 }
  0x2e   :  { %529 = vmatpush.bf16.msrb.mxu0 %v890_v55 }
  0x2f   :  { %542 = vmatpush.bf16.msrb.mxu1 %v898_v56 }
  0x31   :  { %614 = vmatpush.bf16.msrb.mxu3 %v903_v12 }
  0x32   :  { %530 = vmatpush.bf16.msrb.mxu0 %v889_v57 }
  0x33   :  { %543 = vmatpush.bf16.msrb.mxu1 %v897_v58  ;;  %836 = vmatmul.msk.bf16.vlgmr.msrb.gmra.mxu2 %vm470_vm0, %v73_v62 }
  0x36   :  { %531 = vmatpush.bf16.msrb.mxu0 %v888_v60 }
  0x37   :  { %544 = vmatpush.bf16.msrb.mxu1 %v896_v61 }
  0x3a   :  { %532 = vmatpush.bf16.msrb.mxu0 %v887_v63 }
  0x3b   :  { %545 = vmatpush.bf16.msrb.mxu1 %v895_v0 }
  0x3e   :  { %533 = vmatpush.bf16.msrb.mxu0 %v886_v1 }
  0x3f   :  { %546 = vmatpush.bf16.msrb.mxu1 %v894_v2 }
  0x41   :  { %534 = vmatmul.bf16.vlgmr.msrb.gmra.mxu0 %v71_v5 }
  0x42   :  { %547 = vmatmul.bf16.vlgmr.msrb.gmra.mxu1 %v72_v6 }
  0x9e   :  { %v483_v10 = vpop.f32.mrf.mxu0 }
  0x9f   :  { %v496_v11 = vpop.f32.mrf.mxu1  ;;  %v484_v18 = vadd.f32 %v910_v16, %v483_v10 }
  0xa1   :  { %v497_v20 = vadd.f32 %v496_v11, %v484_v18 }
  0xa6   :  { %v485_v13 = vpop.f32.mrf.mxu0  ;;  %v509_v15 = vpop.f32.mrf.mxu2 }
  0xa7   :  { %v498_v14 = vpop.f32.mrf.mxu1  ;;  %v522_v17 = vpop.f32.mrf.mxu3  ;;  %v510_v22 = vadd.f32 %v509_v15, %v497_v20 }
  0xa9   :  { %v523_v24 = vadd.f32 %v522_v17, %v510_v22 }
  0xae   :  { %v511_v19 = vpop.f32.mrf.mxu2 }
  0xaf   :  { %v524_v21 = vpop.f32.mrf.mxu3 }
  0xb6   :  { %v561_v23 = vpop.f32.mrf.mxu2 }
  0xbe   :  { %v535_v25 = vpop.f32.mrf.mxu0  ;;  %v563_v29 = vpop.f32.mrf.mxu2 }
  0xbf   :  { %v548_v26 = vpop.f32.mrf.mxu1  ;;  %v536_v27 = vadd.f32 %v535_v25, %v523_v24 }
  0xc1   :  { %v549_v28 = vadd.f32 %v548_v26, %v536_v27 }
  0xc3   :  { %v562_v30 = vadd.f32 %v561_v23, %v549_v28 }
  0xc5   :  { %v565_v31 = vmax.f32 %v562_v30, 0.0 }
  0xc6   :  { %v537_v32 = vpop.f32.mrf.mxu0 }
  0xc7   :  { %v550_v33 = vpop.f32.mrf.mxu1  ;;  %v566_v34 = vpack.c.bf16 %v565_v31, %v565_v31 }
  0xc9   :  { %853 = vmatmul.msk.bf16.vlgmr.msrb.gmra.mxu3 %vm603_vm1, %v566_v34 }
 0x14c   :  { %v616_v36 = vpop.f32.mrf.mxu3 }
 0x14d   :  { %v617_v37 = vadd.f32 %v911_v35, %v616_v36 }
 0x14f   :  { %621 = vst.msk [vmem:[#allocation2] sm:$0xff] %vm620_vm2, %v617_v37 }
 0x154   :  { %v618_v38 = vpop.f32.mrf.mxu3 }
 0x155   :  { %625 = vsyncadd [#allocation3], 96  ;;  %s628_s15 = sshll.u32 %s1168_s5, 4  ;;  %s938_s16 = smov [#allocation2]   ;;  %s629_s15 = int_to_ptr.hbm [resolvable:$true] %s628_s15 }
 0x156   :  { %s626_s17 = sshll.u32 %s938_s16, 4  ;;  %s939_s18 = smov 32   ;;  %s627_s17 = int_to_ptr.vmem [resolvable:$true] %s626_s17 }
 0x157   :  { %s940_s19 = smov 2  }
 0x158   :  { %634 = dma.vmem_to_hbm [thread:$0]  %s627_s17, 32, %s629_s15, [#allocation3], %s939_s18, %s939_s18, %s940_s19  }
 0x159   :  { %936 = dma.done.wait [#allocation3], 128  }
 0x15a   :  { %937 = vsyncadd [#allocation3], 4294967168 }
 0x15b   :  { %639 = vsyncpa [#allocation3], 1 }

</bundles_post_ra>
